<compile_context>
chip_gen: v7x
topology: tpu7x:2x2x1
jax: 0.10.0
libtpu: 0.0.40
codegen_flags: <defaults>
</compile_context>

<pallas_src>
import math
import numpy as np
import jax
import jax.numpy as jnp
from jax.experimental import pallas as pl
from jax.experimental.pallas import tpu as pltpu


# ----------------------------------------------------------------------------
# Pallas kernels
# ----------------------------------------------------------------------------
def proj1_kernel(x_ref, wf_ref, wb_ref, bf_ref, bb_ref, of_ref, ob_ref):
    """Hoisted input projection of BiLSTM layer 1 (single feature block input).

    of = x @ W_ih_fwd + (b_ih+b_hh)_fwd ; ob likewise for the backward direction.
    bf16 matmul operands, f32 accumulation/outputs.
    """
    x = x_ref[...].astype(jnp.bfloat16)
    gf = jnp.dot(x, wf_ref[...], preferred_element_type=jnp.float32) + bf_ref[...]
    gb = jnp.dot(x, wb_ref[...], preferred_element_type=jnp.float32) + bb_ref[...]
    of_ref[...] = gf.astype(of_ref.dtype)
    ob_ref[...] = gb.astype(ob_ref.dtype)


def proj2_kernel(xa_ref, xb_ref, wfa_ref, wfb_ref, wba_ref, wbb_ref,
                 bf_ref, bb_ref, of_ref, ob_ref):
    """Hoisted input projection of BiLSTM layer 2.

    The previous layer's fwd/bwd hidden halves are consumed separately (no concatenate):
      g_fwd = h_f @ W_ih_fwd[:H1] + h_b @ W_ih_fwd[H1:] + b_fwd   (same for backward gates).
    """
    xa = xa_ref[...].astype(jnp.bfloat16)
    xb = xb_ref[...].astype(jnp.bfloat16)
    gf = (jnp.dot(xa, wfa_ref[...], preferred_element_type=jnp.float32)
          + jnp.dot(xb, wfb_ref[...], preferred_element_type=jnp.float32)
          + bf_ref[...])
    gb = (jnp.dot(xa, wba_ref[...], preferred_element_type=jnp.float32)
          + jnp.dot(xb, wbb_ref[...], preferred_element_type=jnp.float32)
          + bb_ref[...])
    of_ref[...] = gf.astype(of_ref.dtype)
    ob_ref[...] = gb.astype(ob_ref.dtype)


def bilstm_step_kernel(gxf_ref, gxb_ref, whhf_ref, whhb_ref,
                       of_ref, ob_ref, hf_scr, cf_scr, hb_scr, cb_scr):
    """One time step of BOTH directions of a bidirectional LSTM.

    grid = (batch_tiles ["parallel"], seq ["arbitrary"]).  (h, c) of each direction persist
    in VMEM scratch across the sequential seq axis and are re-initialised at t == 0 of each
    batch tile.  The input projection (incl. bias) is precomputed, so the step only does
    h_prev @ W_hh (bf16 operands, f32 accumulate) plus f32 elementwise gating.
    Gate order follows PyTorch: i, f, g, o.
    """
    t = pl.program_id(1)

    @pl.when(t == 0)
    def _():
        hf_scr[...] = jnp.zeros_like(hf_scr)
        cf_scr[...] = jnp.zeros_like(cf_scr)
        hb_scr[...] = jnp.zeros_like(hb_scr)
        cb_scr[...] = jnp.zeros_like(cb_scr)

    H = hf_scr.shape[-1]

    def cell(gx, h_prev, c_prev, whh):
        gates = gx + jnp.dot(h_prev.astype(jnp.bfloat16), whh,
                             preferred_element_type=jnp.float32)
        i_g = jax.nn.sigmoid(gates[:, 0 * H:1 * H])
        f_g = jax.nn.sigmoid(gates[:, 1 * H:2 * H])
        g_g = jnp.tanh(gates[:, 2 * H:3 * H])
        o_g = jax.nn.sigmoid(gates[:, 3 * H:4 * H])
        c_new = f_g * c_prev + i_g * g_g
        h_new = o_g * jnp.tanh(c_new)
        return h_new, c_new

    # Forward direction: consumes sequence position t, writes position t.
    h_f, c_f = cell(gxf_ref[0], hf_scr[...], cf_scr[...], whhf_ref[...])
    hf_scr[...] = h_f
    cf_scr[...] = c_f
    of_ref[0] = h_f.astype(of_ref.dtype)

    # Backward direction: consumes sequence position S-1-t, writes position S-1-t.
    h_b, c_b = cell(gxb_ref[0], hb_scr[...], cb_scr[...], whhb_ref[...])
    hb_scr[...] = h_b
    cb_scr[...] = c_b
    ob_ref[0] = h_b.astype(ob_ref.dtype)


def ff_tanh_kernel(xa_ref, xb_ref, waT_ref, wbT_ref, b_ref, o_ref):
    """Final linear (2*H2 -> O) + tanh, computed transposed so the output is lane-dense:
       o[(O, R)] = tanh(WaT @ xa^T + WbT @ xb^T + b), WaT/WbT pre-transposed (O, H2)."""
    dn = (((1,), (1,)), ((), ()))          # A @ B^T : contract feature dim of both operands
    xa = xa_ref[...].astype(jnp.bfloat16)
    xb = xb_ref[...].astype(jnp.bfloat16)
    y = (jax.lax.dot_general(waT_ref[...], xa, dn, preferred_element_type=jnp.float32)
         + jax.lax.dot_general(wbT_ref[...], xb, dn, preferred_element_type=jnp.float32)
         + b_ref[...])
    o_ref[...] = jnp.tanh(y).astype(o_ref.dtype)


# ----------------------------------------------------------------------------
# Wrappers
# ----------------------------------------------------------------------------
def _row_tile(n_rows, max_tile):
    return n_rows if n_rows <= max_tile else max_tile


def proj_layer1(x_flat, wf, wb, bf, bb, *, row_tile=512):
    """gx_fwd, gx_bwd = x_flat @ W_ih_{f,b} + b_{f,b}  over all S*N rows (row-tiled)."""
    n, in_f = x_flat.shape
    g = wf.shape[1]
    r = _row_tile(n, row_tile)
    return pl.pallas_call(
        proj1_kernel,
        out_shape=[jax.ShapeDtypeStruct((n, g), jnp.float32)] * 2,
        grid_spec=pltpu.PrefetchScalarGridSpec(
            num_scalar_prefetch=0,
            grid=(pl.cdiv(n, r),),
            in_specs=[
                pl.BlockSpec((r, in_f), lambda i: (i, 0)),
                pl.BlockSpec((in_f, g), lambda i: (0, 0)),
                pl.BlockSpec((in_f, g), lambda i: (0, 0)),
                pl.BlockSpec((1, g), lambda i: (0, 0)),
                pl.BlockSpec((1, g), lambda i: (0, 0)),
            ],
            out_specs=[
                pl.BlockSpec((r, g), lambda i: (i, 0)),
                pl.BlockSpec((r, g), lambda i: (i, 0)),
            ],
        ),
        compiler_params=pltpu.CompilerParams(dimension_semantics=("parallel",)),
    )(x_flat, wf, wb, bf, bb)


def proj_layer2(xa_flat, xb_flat, wfa, wfb, wba, wbb, bf, bb, *, row_tile=512):
    """Same as proj_layer1 but the input is the previous layer's (fwd, bwd) hidden halves."""
    n, h1 = xa_flat.shape
    g = wfa.shape[1]
    r = _row_tile(n, row_tile)
    return pl.pallas_call(
        proj2_kernel,
        out_shape=[jax.ShapeDtypeStruct((n, g), jnp.float32)] * 2,
        grid_spec=pltpu.PrefetchScalarGridSpec(
            num_scalar_prefetch=0,
            grid=(pl.cdiv(n, r),),
            in_specs=[
                pl.BlockSpec((r, h1), lambda i: (i, 0)),
                pl.BlockSpec((r, h1), lambda i: (i, 0)),
                pl.BlockSpec((h1, g), lambda i: (0, 0)),
                pl.BlockSpec((h1, g), lambda i: (0, 0)),
                pl.BlockSpec((h1, g), lambda i: (0, 0)),
                pl.BlockSpec((h1, g), lambda i: (0, 0)),
                pl.BlockSpec((1, g), lambda i: (0, 0)),
                pl.BlockSpec((1, g), lambda i: (0, 0)),
            ],
            out_specs=[
                pl.BlockSpec((r, g), lambda i: (i, 0)),
                pl.BlockSpec((r, g), lambda i: (i, 0)),
            ],
        ),
        compiler_params=pltpu.CompilerParams(dimension_semantics=("parallel",)),
    )(xa_flat, xb_flat, wfa, wfb, wba, wbb, bf, bb)


def run_bilstm(gxf, gxb, whhf, whhb, *, batch_tile=256):
    """Fused bidirectional recurrence.

    gxf / gxb: (S, N, 4H) precomputed input gates (fwd indexed by t, bwd by original position).
    Returns (h_fwd, h_bwd), each (S, N, H).
    batch_tile: rows of the batch processed per grid step (use 128 on v5e, 256 on v6e/v7x);
    the batch axis is "parallel" so independent tiles shard across v7x's two TensorCores.
    """
    S, N, G = gxf.shape
    H = G // 4
    bt = _row_tile(N, batch_tile)
    n_bt = pl.cdiv(N, bt)
    out_sd = jax.ShapeDtypeStruct((S, N, H), jnp.float32)
    return pl.pallas_call(
        bilstm_step_kernel,
        out_shape=[out_sd, out_sd],
        grid_spec=pltpu.PrefetchScalarGridSpec(
            num_scalar_prefetch=0,
            grid=(n_bt, S),
            in_specs=[
                pl.BlockSpec((1, bt, G), lambda b, t: (t, b, 0)),
                pl.BlockSpec((1, bt, G), lambda b, t: (S - 1 - t, b, 0)),
                pl.BlockSpec((H, G), lambda b, t: (0, 0)),
                pl.BlockSpec((H, G), lambda b, t: (0, 0)),
            ],
            out_specs=[
                pl.BlockSpec((1, bt, H), lambda b, t: (t, b, 0)),
                pl.BlockSpec((1, bt, H), lambda b, t: (S - 1 - t, b, 0)),
            ],
            scratch_shapes=[
                pltpu.VMEM((bt, H), jnp.float32),   # h fwd
                pltpu.VMEM((bt, H), jnp.float32),   # c fwd
                pltpu.VMEM((bt, H), jnp.float32),   # h bwd
                pltpu.VMEM((bt, H), jnp.float32),   # c bwd
            ],
        ),
        compiler_params=pltpu.CompilerParams(
            dimension_semantics=("parallel", "arbitrary")),
    )(gxf, gxb, whhf, whhb)


def ff_tanh(xa_flat, xb_flat, waT, wbT, b, *, row_tile=512):
    """tanh(concat(xa, xb) @ W + b), computed transposed -> (O, N) lane-dense output."""
    n, h2 = xa_flat.shape
    o = waT.shape[0]
    r = _row_tile(n, row_tile)
    return pl.pallas_call(
        ff_tanh_kernel,
        out_shape=jax.ShapeDtypeStruct((o, n), jnp.float32),
        grid_spec=pltpu.PrefetchScalarGridSpec(
            num_scalar_prefetch=0,
            grid=(pl.cdiv(n, r),),
            in_specs=[
                pl.BlockSpec((r, h2), lambda i: (i, 0)),
                pl.BlockSpec((r, h2), lambda i: (i, 0)),
                pl.BlockSpec((o, h2), lambda i: (0, 0)),
                pl.BlockSpec((o, h2), lambda i: (0, 0)),
                pl.BlockSpec((o, 1), lambda i: (0, 0)),
            ],
            out_specs=pl.BlockSpec((o, r), lambda i: (0, i)),
        ),
        compiler_params=pltpu.CompilerParams(dimension_semantics=("parallel",)),
    )(xa_flat, xb_flat, waT, wbT, b)


def jnf_forward(x, kp, *, batch_tile=256, row_tile=512):
    """JNF.forward, wide-band, CRM + tanh.  x: [B, C, F, T] -> mask [B, 2, F, T]."""
    B, C, F, T = x.shape
    S, N = F, B * T
    # permute(2, 0, 3, 1).reshape(F, B*T, C)
    xs = jnp.transpose(x, (2, 0, 3, 1)).reshape(S, N, C)
    x_flat = xs.reshape(S * N, C)

    # ---- layer 1 -------------------------------------------------------------
    gx1f, gx1b = proj_layer1(x_flat, kp["w1in_f"], kp["w1in_b"],
                             kp["b1_f"], kp["b1_b"], row_tile=row_tile)
    h1f, h1b = run_bilstm(gx1f.reshape(S, N, -1), gx1b.reshape(S, N, -1),
                          kp["whh1_f"], kp["whh1_b"], batch_tile=batch_tile)
    # dropout(p=0) -> identity

    # ---- layer 2 -------------------------------------------------------------
    gx2f, gx2b = proj_layer2(h1f.reshape(S * N, -1), h1b.reshape(S * N, -1),
                             kp["w2_fa"], kp["w2_fb"], kp["w2_ba"], kp["w2_bb"],
                             kp["b2_f"], kp["b2_b"], row_tile=row_tile)
    h2f, h2b = run_bilstm(gx2f.reshape(S, N, -1), gx2b.reshape(S, N, -1),
                          kp["whh2_f"], kp["whh2_b"], batch_tile=batch_tile)

    # ---- output projection + tanh (transposed, lane-dense) -------------------
    yT = ff_tanh(h2f.reshape(S * N, -1), h2b.reshape(S * N, -1),
                 kp["ffw_aT"], kp["ffw_bT"], kp["ffb"], row_tile=row_tile)   # (O, S*N)

    # (O, F*B*T) -> (O, F, B, T) -> [B, O, F, T]
    y = yT.reshape(-1, F, B, T).transpose(2, 0, 1, 3)
    return y


# ----------------------------------------------------------------------------
# Deterministic parameter init (PyTorch-style uniform(-1/sqrt(H), 1/sqrt(H)))
# ----------------------------------------------------------------------------
def init_lstm_dir(key, in_size, hidden):
    k = 1.0 / math.sqrt(hidden)
    k1, k2, k3, k4 = jax.random.split(key, 4)
    wih = jax.random.uniform(k1, (in_size, 4 * hidden), jnp.float32, -k, k)
    whh = jax.random.uniform(k2, (hidden, 4 * hidden), jnp.float32, -k, k)
    b_ih = jax.random.uniform(k3, (4 * hidden,), jnp.float32, -k, k)
    b_hh = jax.random.uniform(k4, (4 * hidden,), jnp.float32, -k, k)
    bias = (b_ih + b_hh).reshape(1, 4 * hidden)
    return (wih, whh, bias)


def init_params(key, in_feat, h1, h2, out_feat):
    keys = jax.random.split(key, 6)
    params = {
        "lstm1_fwd": init_lstm_dir(keys[0], in_feat, h1),
        "lstm1_bwd": init_lstm_dir(keys[1], in_feat, h1),
        "lstm2_fwd": init_lstm_dir(keys[2], 2 * h1, h2),
        "lstm2_bwd": init_lstm_dir(keys[3], 2 * h1, h2),
    }
    kf = 1.0 / math.sqrt(2 * h2)
    params["ff_w"] = jax.random.uniform(keys[4], (2 * h2, out_feat), jnp.float32, -kf, kf)
    params["ff_b"] = jax.random.uniform(keys[5], (1, out_feat), jnp.float32, -kf, kf)
    return params


def prepare_params(raw):
    """Repack raw (PyTorch-layout) params into the kernel-facing layout (bf16 weights)."""
    bf16 = jnp.bfloat16
    w1f, whh1f, b1f = raw["lstm1_fwd"]
    w1b, whh1b, b1b = raw["lstm1_bwd"]
    w2f, whh2f, b2f = raw["lstm2_fwd"]
    w2b, whh2b, b2b = raw["lstm2_bwd"]
    h1 = whh1f.shape[0]
    h2 = whh2f.shape[0]
    return {
        # layer 1
        "w1in_f": w1f.astype(bf16), "w1in_b": w1b.astype(bf16),
        "b1_f": b1f, "b1_b": b1b,
        "whh1_f": whh1f.astype(bf16), "whh1_b": whh1b.astype(bf16),
        # layer 2 (input weights split by which hidden half they consume)
        "w2_fa": w2f[:h1].astype(bf16), "w2_fb": w2f[h1:].astype(bf16),
        "w2_ba": w2b[:h1].astype(bf16), "w2_bb": w2b[h1:].astype(bf16),
        "b2_f": b2f, "b2_b": b2b,
        "whh2_f": whh2f.astype(bf16), "whh2_b": whh2b.astype(bf16),
        # FF (pre-transposed for the lane-dense transposed kernel)
        "ffw_aT": raw["ff_w"][:h2].T.astype(bf16),   # (O, H2)
        "ffw_bT": raw["ff_w"][h2:].T.astype(bf16),   # (O, H2)
        "ffb": raw["ff_b"].T,                        # (O, 1) f32
    }


# ----------------------------------------------------------------------------
# Pure-JAX f32 reference (lax.scan) for the correctness check
# ----------------------------------------------------------------------------
def lstm_ref(x_seq, wih, whh, bias, *, reverse=False):
    H = whh.shape[0]
    xs = x_seq[::-1] if reverse else x_seq
    B = x_seq.shape[1]

    def step(carry, x_t):
        h, c = carry
        g = x_t @ wih + h @ whh + bias[0]
        i = jax.nn.sigmoid(g[:, :H])
        f = jax.nn.sigmoid(g[:, H:2 * H])
        gg = jnp.tanh(g[:, 2 * H:3 * H])
        o = jax.nn.sigmoid(g[:, 3 * H:])
        c = f * c + i * gg
        h = o * jnp.tanh(c)
        return (h, c), h

    (_, _), hs = jax.lax.scan(step, (jnp.zeros((B, H)), jnp.zeros((B, H))), xs)
    return hs[::-1] if reverse else hs


def jnf_forward_ref(x, params):
    B, C, F, T = x.shape
    xs = jnp.transpose(x, (2, 0, 3, 1)).reshape(F, B * T, C)
    h1 = jnp.concatenate([lstm_ref(xs, *params["lstm1_fwd"]),
                          lstm_ref(xs, *params["lstm1_bwd"], reverse=True)], axis=-1)
    h2 = jnp.concatenate([lstm_ref(h1, *params["lstm2_fwd"]),
                          lstm_ref(h1, *params["lstm2_bwd"], reverse=True)], axis=-1)
    y = jnp.tanh(h2 @ params["ff_w"] + params["ff_b"][0])
    return y.reshape(F, B, T, -1).transpose(1, 3, 0, 2)


# ----------------------------------------------------------------------------
if __name__ == "__main__":
    # Small config consistent with JNF: n_channels=2 -> LSTM input C = 2*n_channels = 4,
    # n_freqs=16, n_time_steps=8, batch=2, n_lstm_hidden1=32, n_lstm_hidden2=16, CRM (2 outs).
    B, C, F, T = 2, 4, 16, 8
    H1, H2, OUT = 32, 16, 2

    key = jax.random.PRNGKey(0)
    kx, kp = jax.random.split(key)
    x = jax.random.normal(kx, (B, C, F, T), jnp.float32)
    raw_params = init_params(kp, C, H1, H2, OUT)
    kernel_params = prepare_params(raw_params)

    y = jax.block_until_ready(jnf_forward(x, kernel_params))
    assert y.shape == (B, OUT, F, T), y.shape

    y_ref = jax.block_until_ready(jnf_forward_ref(x, raw_params))
    np.testing.assert_allclose(np.asarray(y), np.asarray(y_ref), atol=2e-2, rtol=2e-2)

    print("KERNEL_OK")
</pallas_src>

<mosaic_0001>
module attributes {stable_mosaic.version = 11 : i64} {
  func.func @proj1_kernel(%arg0: i32, %arg1: memref<256x4xf32, #tpu.memory_space<vmem>>, %arg2: memref<4x128xbf16, #tpu.memory_space<vmem>>, %arg3: memref<4x128xbf16, #tpu.memory_space<vmem>>, %arg4: memref<1x128xf32, #tpu.memory_space<vmem>>, %arg5: memref<1x128xf32, #tpu.memory_space<vmem>>, %arg6: memref<256x128xf32, #tpu.memory_space<vmem>>, %arg7: memref<256x128xf32, #tpu.memory_space<vmem>>) attributes {dimension_semantics = [#tpu.dimension_semantics<parallel>], iteration_bounds = array<i64: 1>, scalar_prefetch = 0 : i64, scratch_operands = 0 : i64, tpu.core_type = #tpu.core_type<tc>, window_params = [{transform_indices = @transform_0, window_bounds = array<i64: 256, 4>}, {pipeline_mode = #tpu.pipeline_mode<synchronous>, transform_indices = @transform_1, window_bounds = array<i64: 4, 128>}, {pipeline_mode = #tpu.pipeline_mode<synchronous>, transform_indices = @transform_2, window_bounds = array<i64: 4, 128>}, {pipeline_mode = #tpu.pipeline_mode<synchronous>, transform_indices = @transform_3, window_bounds = array<i64: 1, 128>}, {pipeline_mode = #tpu.pipeline_mode<synchronous>, transform_indices = @transform_4, window_bounds = array<i64: 1, 128>}, {transform_indices = @transform_5, window_bounds = array<i64: 256, 128>}, {transform_indices = @transform_6, window_bounds = array<i64: 256, 128>}]} {
    %c0 = arith.constant 0 : index
    %c0_0 = arith.constant 0 : index
    %0 = vector.load %arg1[%c0, %c0_0] : memref<256x4xf32, #tpu.memory_space<vmem>>, vector<256x4xf32>
    %1 = arith.truncf %0 : vector<256x4xf32> to vector<256x4xbf16>
    %c0_1 = arith.constant 0 : index
    %c0_2 = arith.constant 0 : index
    %2 = vector.load %arg2[%c0_1, %c0_2] : memref<4x128xbf16, #tpu.memory_space<vmem>>, vector<4x128xbf16>
    %cst = arith.constant dense<0.000000e+00> : vector<256x128xf32>
    %3 = tpu.matmul %1, %2, %cst {dimension_numbers = #tpu.dot_dimension_numbers<[1], [0], [0], [1], [0, 0, 1, 1], [], []>} : vector<256x4xbf16>, vector<4x128xbf16>, vector<256x128xf32> -> vector<256x128xf32>
    %c0_3 = arith.constant 0 : index
    %c0_4 = arith.constant 0 : index
    %4 = vector.load %arg4[%c0_3, %c0_4] : memref<1x128xf32, #tpu.memory_space<vmem>>, vector<1x128xf32>
    %5 = vector.broadcast %4 : vector<1x128xf32> to vector<256x128xf32>
    %6 = arith.addf %3, %5 : vector<256x128xf32>
    %c0_5 = arith.constant 0 : index
    %c0_6 = arith.constant 0 : index
    %7 = vector.load %arg3[%c0_5, %c0_6] : memref<4x128xbf16, #tpu.memory_space<vmem>>, vector<4x128xbf16>
    %cst_7 = arith.constant dense<0.000000e+00> : vector<256x128xf32>
    %8 = tpu.matmul %1, %7, %cst_7 {dimension_numbers = #tpu.dot_dimension_numbers<[1], [0], [0], [1], [0, 0, 1, 1], [], []>} : vector<256x4xbf16>, vector<4x128xbf16>, vector<256x128xf32> -> vector<256x128xf32>
    %c0_8 = arith.constant 0 : index
    %c0_9 = arith.constant 0 : index
    %9 = vector.load %arg5[%c0_8, %c0_9] : memref<1x128xf32, #tpu.memory_space<vmem>>, vector<1x128xf32>
    %10 = vector.broadcast %9 : vector<1x128xf32> to vector<256x128xf32>
    %11 = arith.addf %8, %10 : vector<256x128xf32>
    %c0_10 = arith.constant 0 : index
    %c0_11 = arith.constant 0 : index
    %12 = vector.load %arg6[%c0_10, %c0_11] : memref<256x128xf32, #tpu.memory_space<vmem>>, vector<256x128xf32>
    tpu.vector_store %arg6[%c0_10, %c0_11], %6 {strides = array<i32>} : memref<256x128xf32, #tpu.memory_space<vmem>>, vector<256x128xf32>,
    %c0_12 = arith.constant 0 : index
    %c0_13 = arith.constant 0 : index
    %13 = vector.load %arg7[%c0_12, %c0_13] : memref<256x128xf32, #tpu.memory_space<vmem>>, vector<256x128xf32>
    tpu.vector_store %arg7[%c0_12, %c0_13], %11 {strides = array<i32>} : memref<256x128xf32, #tpu.memory_space<vmem>>, vector<256x128xf32>,
    return
  }
  func.func @transform_0(%arg0: i32) -> (i32, i32) {
    %c0_i32 = arith.constant 0 : i32
    %c0_i32_0 = arith.constant 0 : i32
    return %arg0, %c0_i32 : i32, i32
  }
  func.func @transform_1(%arg0: i32) -> (i32, i32) {
    %c0_i32 = arith.constant 0 : i32
    %c0_i32_0 = arith.constant 0 : i32
    %c0_i32_1 = arith.constant 0 : i32
    return %c0_i32, %c0_i32_0 : i32, i32
  }
  func.func @transform_2(%arg0: i32) -> (i32, i32) {
    %c0_i32 = arith.constant 0 : i32
    %c0_i32_0 = arith.constant 0 : i32
    %c0_i32_1 = arith.constant 0 : i32
    return %c0_i32, %c0_i32_0 : i32, i32
  }
  func.func @transform_3(%arg0: i32) -> (i32, i32) {
    %c0_i32 = arith.constant 0 : i32
    %c0_i32_0 = arith.constant 0 : i32
    %c0_i32_1 = arith.constant 0 : i32
    return %c0_i32, %c0_i32_0 : i32, i32
  }
  func.func @transform_4(%arg0: i32) -> (i32, i32) {
    %c0_i32 = arith.constant 0 : i32
    %c0_i32_0 = arith.constant 0 : i32
    %c0_i32_1 = arith.constant 0 : i32
    return %c0_i32, %c0_i32_0 : i32, i32
  }
  func.func @transform_5(%arg0: i32) -> (i32, i32) {
    %c0_i32 = arith.constant 0 : i32
    %c0_i32_0 = arith.constant 0 : i32
    return %arg0, %c0_i32 : i32, i32
  }
  func.func @transform_6(%arg0: i32) -> (i32, i32) {
    %c0_i32 = arith.constant 0 : i32
    %c0_i32_0 = arith.constant 0 : i32
    return %arg0, %c0_i32 : i32, i32
  }
}

</mosaic_0001>

<bundles_post_ra>
// kernel: tpu_custom_call.1
= control target key start
LH: loop header
LB: loop body
LE: loop exit
PB: predicated region body
PF: predicated region fallthrough
CT: control target
= control target key end

     0   :  { %12 = vsyncpa [#allocation3], 0  ;;  %vm130_vm0 = vcmask 1041408   ;;  %vm81_vm1 = vcmask 31744   ;;  %s1031_s0 = inlined_call_operand.vmem [shape: f32[256,4], index: 0, kind: input, shape index: {}]   ;;  %s1032_s1 = inlined_call_operand.vmem [shape: bf16[4,128], index: 1, kind: input, shape index: {}]   ;;  %s1033_s2 = inlined_call_operand.vmem [shape: bf16[4,128], index: 2, kind: input, shape index: {}]   ;;  %s1034_s3 = inlined_call_operand.vmem [shape: f32[1,128], index: 3, kind: input, shape index: {}]   ;;  %s1035_s4 = inlined_call_operand.vmem [shape: f32[1,128], index: 4, kind: input, shape index: {}]   ;;  %s1036_s5 = inlined_call_operand.hbm [shape: f32[256,128], index: 5, kind: output, shape index: {0}]   ;;  %s1037_s6 = inlined_call_operand.hbm [shape: f32[256,128], index: 6, kind: output, shape index: {1}]  }
   0x1   :  { %v73_v0 = vld [vmem:[%s1032_s1] sm:$0x3]  ;;  %v26_v5 = vld [vmem:[%s1031_s0 + $0x8] sm:$0xff]  ;;  %v27_v6 = vld [vmem:[%s1031_s0 + $0x10] sm:$0xff] }
   0x2   :  { %v295_v1 = vld [vmem:[%s1033_s2] sm:$0x3]  ;;  %699 = vmatprep.subr.msk.bf16.mxu0 %vm130_vm0, %v73_v0  ;;  %v132_v3 = vsel %vm130_vm0, %v73_v0, 0  ;;  %v28_v7 = vld [vmem:[%s1031_s0 + $0x18] sm:$0xff]  ;;  %v30_v11 = vld [vmem:[%s1031_s0 + $0x28] sm:$0xff] }
   0x3   :  { %v25_v2 = vld [vmem:[%s1031_s0] sm:$0xff]  ;;  %700 = vmatprep.subr.msk.bf16.mxu1 %vm130_vm0, %v295_v1  ;;  %v304_v4 = vsel %vm130_vm0, %v295_v1, 0  ;;  %632 = vmatpush3.bf16.msra.mxu0 %v132_v3  ;;  %v58_v9 = vpack.c.bf16 %v28_v7, %v27_v6  ;;  %v31_v13 = vld [vmem:[%s1031_s0 + $0x30] sm:$0xff]  ;;  %v32_v14 = vld [vmem:[%s1031_s0 + $0x38] sm:$0xff] }
   0x4   :  { %666 = vmatpush3.bf16.msra.mxu1 %v304_v4  ;;  %v57_v8 = vpack.c.bf16 %v26_v5, %v25_v2  ;;  %v29_v10 = vld [vmem:[%s1031_s0 + $0x20] sm:$0xff]  ;;  %v34_v16 = vld [vmem:[%s1031_s0 + $0x48] sm:$0xff]  ;;  %v60_v17 = vpack.c.bf16 %v32_v14, %v31_v13 }
   0x5   :  { %v59_v12 = vpack.c.bf16 %v30_v11, %v29_v10  ;;  %v33_v15 = vld [vmem:[%s1031_s0 + $0x40] sm:$0xff] }
   0x6   :  { %633 = vmatprep.mubr.msk.bf16.mxu0 %vm81_vm1, %v57_v8  ;;  %667 = vmatprep.mubr.msk.bf16.mxu1 %vm81_vm1, %v57_v8  ;;  %v61_v18 = vpack.c.bf16 %v34_v16, %v33_v15 }
   0x7   :  { %634 = vmatmul.mubr.msk.bf16.vlgmr.msra.gmra.mrb[0].mxu0 %vm81_vm1, %v58_v9  ;;  %668 = vmatmul.mubr.msk.bf16.vlgmr.msra.gmra.mrb[0].mxu1 %vm81_vm1, %v58_v9 }
   0x8   :  { %637 = vmatprep.mubr.msk.bf16.mxu0 %vm81_vm1, %v59_v12  ;;  %671 = vmatprep.mubr.msk.bf16.mxu1 %vm81_vm1, %v59_v12 }
   0x9   :  { %13 = vsyncpa [#allocation5], 0  ;;  %v35_v19 = vld [vmem:[%s1031_s0 + $0x50] sm:$0xff]  ;;  %v36_v20 = vld [vmem:[%s1031_s0 + $0x58] sm:$0xff] }
   0xa   :  { %v37_v21 = vld [vmem:[%s1031_s0 + $0x60] sm:$0xff]  ;;  %v38_v22 = vld [vmem:[%s1031_s0 + $0x68] sm:$0xff]  ;;  %v62_v23 = vpack.c.bf16 %v36_v20, %v35_v19  ;;  %v39_v25 = vld [vmem:[%s1031_s0 + $0x70] sm:$0xff] }
   0xb   :  { %v63_v24 = vpack.c.bf16 %v38_v22, %v37_v21  ;;  %v40_v26 = vld [vmem:[%s1031_s0 + $0x78] sm:$0xff]  ;;  %v41_v27 = vld [vmem:[%s1031_s0 + $0x80] sm:$0xff]  ;;  %v42_v28 = vld [vmem:[%s1031_s0 + $0x88] sm:$0xff] }
   0xc   :  { %v64_v29 = vpack.c.bf16 %v40_v26, %v39_v25  ;;  %v65_v30 = vpack.c.bf16 %v42_v28, %v41_v27  ;;  %v43_v31 = vld [vmem:[%s1031_s0 + $0x90] sm:$0xff]  ;;  %v44_v32 = vld [vmem:[%s1031_s0 + $0x98] sm:$0xff]  ;;  %v45_v33 = vld [vmem:[%s1031_s0 + $0xa0] sm:$0xff] }
   0xd   :  { %v46_v34 = vld [vmem:[%s1031_s0 + $0xa8] sm:$0xff]  ;;  %v66_v35 = vpack.c.bf16 %v44_v32, %v43_v31  ;;  %v47_v37 = vld [vmem:[%s1031_s0 + $0xb0] sm:$0xff]  ;;  %v48_v38 = vld [vmem:[%s1031_s0 + $0xb8] sm:$0xff] }
   0xe   :  { %v67_v36 = vpack.c.bf16 %v46_v34, %v45_v33  ;;  %v49_v39 = vld [vmem:[%s1031_s0 + $0xc0] sm:$0xff]  ;;  %v50_v40 = vld [vmem:[%s1031_s0 + $0xc8] sm:$0xff]  ;;  %v68_v41 = vpack.c.bf16 %v48_v38, %v47_v37  ;;  %v51_v43 = vld [vmem:[%s1031_s0 + $0xd0] sm:$0xff] }
   0xf   :  { %638 = vmatmul.mubr.msk.bf16.gmra.mrb[4].mxu0 %vm81_vm1, %v60_v17  ;;  %672 = vmatmul.mubr.msk.bf16.gmra.mrb[4].mxu1 %vm81_vm1, %v60_v17  ;;  %v69_v42 = vpack.c.bf16 %v50_v40, %v49_v39  ;;  %v52_v44 = vld [vmem:[%s1031_s0 + $0xd8] sm:$0xff]  ;;  %v53_v45 = vld [vmem:[%s1031_s0 + $0xe0] sm:$0xff]  ;;  %v54_v46 = vld [vmem:[%s1031_s0 + $0xe8] sm:$0xff] }
  0x10   :  { %641 = vmatprep.mubr.msk.bf16.mxu0 %vm81_vm1, %v61_v18  ;;  %675 = vmatprep.mubr.msk.bf16.mxu1 %vm81_vm1, %v61_v18  ;;  %v70_v47 = vpack.c.bf16 %v52_v44, %v51_v43  ;;  %v71_v48 = vpack.c.bf16 %v54_v46, %v53_v45  ;;  %v55_v49 = vld [vmem:[%s1031_s0 + $0xf0] sm:$0xff]  ;;  %v56_v50 = vld [vmem:[%s1031_s0 + $0xf8] sm:$0xff]  ;;  %v929_v52 = vld [vmem:[%s1034_s3] ss:$0 sm:$0xff]  ;;  %s753_s0 = smov [#allocation2]  }
  0x11   :  { %v72_v51 = vpack.c.bf16 %v56_v50, %v55_v49  ;;  %v934_v53 = vld [vmem:[%s1035_s4] ss:$0 sm:$0xff]  ;;  %s536_s3 = sshll.u32 %s753_s0, 4  ;;  %s754_s4 = smov [#allocation4]   ;;  %s537_s3 = int_to_ptr.vmem [resolvable:$true] %s536_s3 }
  0x12   :  { %s548_s15 = sshll.u32 %s754_s4, 4  ;;  %s705_s16 = scalar_lea.vmem %s537_s3, 4096  ;;  %s1000_s15 = int_to_ptr.vmem [resolvable:$true] %s548_s15 }
  0x13   :  { %p706_p0 = scmp.ne.s32.totalorder %s537_s3, %s705_s16  ;;  %p710_p1 = scmp.lt.s32.totalorder %s537_s3, %s537_s3 }
  0x14   :  { %p711_p2 = scmp.lt.s32.totalorder %s705_s16, %s705_s16 }
  0x16   :  { %p712_p3 = por %p711_p2, %p710_p1 }
  0x17   :  { %642 = vmatmul.mubr.msk.bf16.gmra.mrb[8].mxu0 %vm81_vm1, %v62_v23  ;;  %676 = vmatmul.mubr.msk.bf16.gmra.mrb[8].mxu1 %vm81_vm1, %v62_v23 }
  0x18   :  { %645 = vmatprep.mubr.msk.bf16.mxu0 %vm81_vm1, %v63_v24  ;;  %679 = vmatprep.mubr.msk.bf16.mxu1 %vm81_vm1, %v63_v24  ;;  %p713_p4 = pnand %p712_p3, %p706_p0 }
  0x1f   :  { %646 = vmatmul.mubr.msk.bf16.gmra.mrb[12].mxu0 %vm81_vm1, %v64_v29  ;;  %680 = vmatmul.mubr.msk.bf16.gmra.mrb[12].mxu1 %vm81_vm1, %v64_v29 }
  0x20   :  { %649 = vmatprep.mubr.msk.bf16.mxu0 %vm81_vm1, %v65_v30  ;;  %683 = vmatprep.mubr.msk.bf16.mxu1 %vm81_vm1, %v65_v30 }
  0x27   :  { %650 = vmatmul.mubr.msk.bf16.gmra.mrb[16].mxu0 %vm81_vm1, %v66_v35  ;;  %684 = vmatmul.mubr.msk.bf16.gmra.mrb[16].mxu1 %vm81_vm1, %v66_v35 }
  0x28   :  { %653 = vmatprep.mubr.msk.bf16.mxu0 %vm81_vm1, %v67_v36  ;;  %687 = vmatprep.mubr.msk.bf16.mxu1 %vm81_vm1, %v67_v36 }
  0x2f   :  { %654 = vmatmul.mubr.msk.bf16.gmra.mrb[20].mxu0 %vm81_vm1, %v68_v41  ;;  %688 = vmatmul.mubr.msk.bf16.gmra.mrb[20].mxu1 %vm81_vm1, %v68_v41 }
  0x30   :  { %657 = vmatprep.mubr.msk.bf16.mxu0 %vm81_vm1, %v69_v42  ;;  %691 = vmatprep.mubr.msk.bf16.mxu1 %vm81_vm1, %v69_v42 }
  0x37   :  { %658 = vmatmul.mubr.msk.bf16.gmra.mrb[24].mxu0 %vm81_vm1, %v70_v47  ;;  %692 = vmatmul.mubr.msk.bf16.gmra.mrb[24].mxu1 %vm81_vm1, %v70_v47 }
  0x38   :  { %661 = vmatprep.mubr.msk.bf16.mxu0 %vm81_vm1, %v71_v48  ;;  %695 = vmatprep.mubr.msk.bf16.mxu1 %vm81_vm1, %v71_v48 }
  0x3f   :  { %662 = vmatmul.mubr.msk.bf16.gmra.mrb[28].mxu0 %vm81_vm1, %v72_v51  ;;  %696 = vmatmul.mubr.msk.bf16.gmra.mrb[28].mxu1 %vm81_vm1, %v72_v51 }
  0xda   :  { %v635_v54 = vpop.f32.mrb[0].mxu0  ;;  %v669_v55 = vpop.f32.mrb[0].mxu1 }
  0xdb   :  { %v177_v56 = vadd.f32 %v635_v54, %v929_v52  ;;  %v349_v57 = vadd.f32 %v669_v55, %v934_v53  ;;  %v168_v58 = vpop.f32.mrb[1].mxu0  ;;  %v340_v59 = vpop.f32.mrb[1].mxu1 }
  0xdc   :  { %v169_v60 = vadd.f32 %v929_v52, %v168_v58  ;;  %v341_v61 = vadd.f32 %v934_v53, %v340_v59  ;;  %v636_v62 = vpop.f32.mrb[2].mxu0  ;;  %v670_v63 = vpop.f32.mrb[2].mxu1 }
  0xdd   :  { %469 = vst [vmem:[#allocation2 + $0x10] sm:$0xff] %v177_v56  ;;  %501 = vst [vmem:[#allocation4 + $0x10] sm:$0xff] %v349_v57  ;;  %v180_v0 = vadd.f32 %v636_v62, %v929_v52  ;;  %v352_v1 = vadd.f32 %v670_v63, %v934_v53  ;;  %v171_v2 = vpop.f32.mrb[3].mxu0  ;;  %v343_v3 = vpop.f32.mrb[3].mxu1 }
  0xde   :  { %467 = vst [vmem:[#allocation2] sm:$0xff] %v169_v60  ;;  %499 = vst [vmem:[#allocation4] sm:$0xff] %v341_v61  ;;  %v172_v4 = vadd.f32 %v929_v52, %v171_v2  ;;  %v344_v5 = vadd.f32 %v934_v53, %v343_v3 }
  0xdf   :  { %470 = vst [vmem:[#allocation2 + $0x18] sm:$0xff] %v180_v0  ;;  %502 = vst [vmem:[#allocation4 + $0x18] sm:$0xff] %v352_v1 }
  0xe0   :  { %468 = vst [vmem:[#allocation2 + $0x8] sm:$0xff] %v172_v4  ;;  %500 = vst [vmem:[#allocation4 + $0x8] sm:$0xff] %v344_v5 }
  0xe2   :  { %v639_v6 = vpop.f32.mrb[4].mxu0  ;;  %v673_v7 = vpop.f32.mrb[4].mxu1 }
  0xe3   :  { %v193_v8 = vadd.f32 %v639_v6, %v929_v52  ;;  %v365_v9 = vadd.f32 %v673_v7, %v934_v53  ;;  %v184_v10 = vpop.f32.mrb[5].mxu0  ;;  %v356_v11 = vpop.f32.mrb[5].mxu1 }
  0xe4   :  { %v185_v12 = vadd.f32 %v929_v52, %v184_v10  ;;  %v357_v13 = vadd.f32 %v934_v53, %v356_v11  ;;  %v640_v14 = vpop.f32.mrb[6].mxu0  ;;  %v674_v15 = vpop.f32.mrb[6].mxu1 }
  0xe5   :  { %473 = vst [vmem:[#allocation2 + $0x30] sm:$0xff] %v193_v8  ;;  %505 = vst [vmem:[#allocation4 + $0x30] sm:$0xff] %v365_v9  ;;  %v196_v16 = vadd.f32 %v640_v14, %v929_v52  ;;  %v368_v17 = vadd.f32 %v674_v15, %v934_v53  ;;  %v187_v18 = vpop.f32.mrb[7].mxu0  ;;  %v359_v19 = vpop.f32.mrb[7].mxu1 }
  0xe6   :  { %471 = vst [vmem:[#allocation2 + $0x20] sm:$0xff] %v185_v12  ;;  %503 = vst [vmem:[#allocation4 + $0x20] sm:$0xff] %v357_v13  ;;  %v188_v20 = vadd.f32 %v929_v52, %v187_v18  ;;  %v360_v21 = vadd.f32 %v934_v53, %v359_v19 }
  0xe7   :  { %474 = vst [vmem:[#allocation2 + $0x38] sm:$0xff] %v196_v16  ;;  %506 = vst [vmem:[#allocation4 + $0x38] sm:$0xff] %v368_v17 }
  0xe8   :  { %472 = vst [vmem:[#allocation2 + $0x28] sm:$0xff] %v188_v20  ;;  %504 = vst [vmem:[#allocation4 + $0x28] sm:$0xff] %v360_v21 }
  0xea   :  { %v643_v22 = vpop.f32.mrb[8].mxu0  ;;  %v677_v23 = vpop.f32.mrb[8].mxu1 }
  0xeb   :  { %v209_v24 = vadd.f32 %v643_v22, %v929_v52  ;;  %v381_v25 = vadd.f32 %v677_v23, %v934_v53  ;;  %v200_v26 = vpop.f32.mrb[9].mxu0  ;;  %v372_v27 = vpop.f32.mrb[9].mxu1 }
  0xec   :  { %v201_v28 = vadd.f32 %v929_v52, %v200_v26  ;;  %v373_v29 = vadd.f32 %v934_v53, %v372_v27  ;;  %v644_v30 = vpop.f32.mrb[10].mxu0  ;;  %v678_v31 = vpop.f32.mrb[10].mxu1 }
  0xed   :  { %477 = vst [vmem:[#allocation2 + $0x50] sm:$0xff] %v209_v24  ;;  %509 = vst [vmem:[#allocation4 + $0x50] sm:$0xff] %v381_v25  ;;  %v212_v32 = vadd.f32 %v644_v30, %v929_v52  ;;  %v384_v33 = vadd.f32 %v678_v31, %v934_v53  ;;  %v203_v34 = vpop.f32.mrb[11].mxu0  ;;  %v375_v35 = vpop.f32.mrb[11].mxu1 }
  0xee   :  { %475 = vst [vmem:[#allocation2 + $0x40] sm:$0xff] %v201_v28  ;;  %507 = vst [vmem:[#allocation4 + $0x40] sm:$0xff] %v373_v29  ;;  %v204_v36 = vadd.f32 %v929_v52, %v203_v34  ;;  %v376_v37 = vadd.f32 %v934_v53, %v375_v35 }
  0xef   :  { %478 = vst [vmem:[#allocation2 + $0x58] sm:$0xff] %v212_v32  ;;  %510 = vst [vmem:[#allocation4 + $0x58] sm:$0xff] %v384_v33 }
  0xf0   :  { %476 = vst [vmem:[#allocation2 + $0x48] sm:$0xff] %v204_v36  ;;  %508 = vst [vmem:[#allocation4 + $0x48] sm:$0xff] %v376_v37 }
  0xf2   :  { %v647_v38 = vpop.f32.mrb[12].mxu0  ;;  %v681_v39 = vpop.f32.mrb[12].mxu1 }
  0xf3   :  { %v225_v40 = vadd.f32 %v647_v38, %v929_v52  ;;  %v397_v41 = vadd.f32 %v681_v39, %v934_v53  ;;  %v216_v42 = vpop.f32.mrb[13].mxu0  ;;  %v388_v43 = vpop.f32.mrb[13].mxu1 }
  0xf4   :  { %v217_v44 = vadd.f32 %v929_v52, %v216_v42  ;;  %v389_v45 = vadd.f32 %v934_v53, %v388_v43  ;;  %v648_v46 = vpop.f32.mrb[14].mxu0  ;;  %v682_v47 = vpop.f32.mrb[14].mxu1 }
  0xf5   :  { %481 = vst [vmem:[#allocation2 + $0x70] sm:$0xff] %v225_v40  ;;  %513 = vst [vmem:[#allocation4 + $0x70] sm:$0xff] %v397_v41  ;;  %v228_v48 = vadd.f32 %v648_v46, %v929_v52  ;;  %v400_v49 = vadd.f32 %v682_v47, %v934_v53  ;;  %v219_v50 = vpop.f32.mrb[15].mxu0  ;;  %v391_v51 = vpop.f32.mrb[15].mxu1 }
  0xf6   :  { %479 = vst [vmem:[#allocation2 + $0x60] sm:$0xff] %v217_v44  ;;  %511 = vst [vmem:[#allocation4 + $0x60] sm:$0xff] %v389_v45  ;;  %v220_v54 = vadd.f32 %v929_v52, %v219_v50  ;;  %v392_v55 = vadd.f32 %v934_v53, %v391_v51 }
  0xf7   :  { %482 = vst [vmem:[#allocation2 + $0x78] sm:$0xff] %v228_v48  ;;  %514 = vst [vmem:[#allocation4 + $0x78] sm:$0xff] %v400_v49 }
  0xf8   :  { %480 = vst [vmem:[#allocation2 + $0x68] sm:$0xff] %v220_v54  ;;  %512 = vst [vmem:[#allocation4 + $0x68] sm:$0xff] %v392_v55 }
  0xfa   :  { %v651_v56 = vpop.f32.mrb[16].mxu0  ;;  %v685_v57 = vpop.f32.mrb[16].mxu1 }
  0xfb   :  { %v241_v58 = vadd.f32 %v651_v56, %v929_v52  ;;  %v413_v59 = vadd.f32 %v685_v57, %v934_v53  ;;  %v232_v60 = vpop.f32.mrb[17].mxu0  ;;  %v404_v61 = vpop.f32.mrb[17].mxu1 }
  0xfc   :  { %v233_v62 = vadd.f32 %v929_v52, %v232_v60  ;;  %v405_v63 = vadd.f32 %v934_v53, %v404_v61  ;;  %v652_v0 = vpop.f32.mrb[18].mxu0  ;;  %v686_v1 = vpop.f32.mrb[18].mxu1 }
  0xfd   :  { %485 = vst [vmem:[#allocation2 + $0x90] sm:$0xff] %v241_v58  ;;  %517 = vst [vmem:[#allocation4 + $0x90] sm:$0xff] %v413_v59  ;;  %v244_v2 = vadd.f32 %v652_v0, %v929_v52  ;;  %v416_v3 = vadd.f32 %v686_v1, %v934_v53  ;;  %v235_v4 = vpop.f32.mrb[19].mxu0  ;;  %v407_v5 = vpop.f32.mrb[19].mxu1 }
  0xfe   :  { %483 = vst [vmem:[#allocation2 + $0x80] sm:$0xff] %v233_v62  ;;  %515 = vst [vmem:[#allocation4 + $0x80] sm:$0xff] %v405_v63  ;;  %v236_v6 = vadd.f32 %v929_v52, %v235_v4  ;;  %v408_v7 = vadd.f32 %v934_v53, %v407_v5 }
  0xff   :  { %486 = vst [vmem:[#allocation2 + $0x98] sm:$0xff] %v244_v2  ;;  %518 = vst [vmem:[#allocation4 + $0x98] sm:$0xff] %v416_v3 }
 0x100   :  { %484 = vst [vmem:[#allocation2 + $0x88] sm:$0xff] %v236_v6  ;;  %516 = vst [vmem:[#allocation4 + $0x88] sm:$0xff] %v408_v7 }
 0x102   :  { %v655_v8 = vpop.f32.mrb[20].mxu0  ;;  %v689_v9 = vpop.f32.mrb[20].mxu1 }
 0x103   :  { %v257_v10 = vadd.f32 %v655_v8, %v929_v52  ;;  %v429_v11 = vadd.f32 %v689_v9, %v934_v53  ;;  %v248_v12 = vpop.f32.mrb[21].mxu0  ;;  %v420_v13 = vpop.f32.mrb[21].mxu1 }
 0x104   :  { %v249_v14 = vadd.f32 %v929_v52, %v248_v12  ;;  %v421_v15 = vadd.f32 %v934_v53, %v420_v13  ;;  %v656_v16 = vpop.f32.mrb[22].mxu0  ;;  %v690_v17 = vpop.f32.mrb[22].mxu1 }
 0x105   :  { %489 = vst [vmem:[#allocation2 + $0xb0] sm:$0xff] %v257_v10  ;;  %521 = vst [vmem:[#allocation4 + $0xb0] sm:$0xff] %v429_v11  ;;  %v260_v18 = vadd.f32 %v656_v16, %v929_v52  ;;  %v432_v19 = vadd.f32 %v690_v17, %v934_v53  ;;  %v251_v20 = vpop.f32.mrb[23].mxu0  ;;  %v423_v21 = vpop.f32.mrb[23].mxu1 }
 0x106   :  { %487 = vst [vmem:[#allocation2 + $0xa0] sm:$0xff] %v249_v14  ;;  %519 = vst [vmem:[#allocation4 + $0xa0] sm:$0xff] %v421_v15  ;;  %v252_v22 = vadd.f32 %v929_v52, %v251_v20  ;;  %v424_v23 = vadd.f32 %v934_v53, %v423_v21 }
 0x107   :  { %490 = vst [vmem:[#allocation2 + $0xb8] sm:$0xff] %v260_v18  ;;  %522 = vst [vmem:[#allocation4 + $0xb8] sm:$0xff] %v432_v19 }
 0x108   :  { %488 = vst [vmem:[#allocation2 + $0xa8] sm:$0xff] %v252_v22  ;;  %520 = vst [vmem:[#allocation4 + $0xa8] sm:$0xff] %v424_v23 }
 0x10a   :  { %v659_v24 = vpop.f32.mrb[24].mxu0  ;;  %v693_v25 = vpop.f32.mrb[24].mxu1 }
 0x10b   :  { %v273_v26 = vadd.f32 %v659_v24, %v929_v52  ;;  %v445_v27 = vadd.f32 %v693_v25, %v934_v53  ;;  %v264_v28 = vpop.f32.mrb[25].mxu0  ;;  %v436_v29 = vpop.f32.mrb[25].mxu1 }
 0x10c   :  { %v265_v30 = vadd.f32 %v929_v52, %v264_v28  ;;  %v437_v31 = vadd.f32 %v934_v53, %v436_v29  ;;  %v660_v32 = vpop.f32.mrb[26].mxu0  ;;  %v694_v33 = vpop.f32.mrb[26].mxu1 }
 0x10d   :  { %493 = vst [vmem:[#allocation2 + $0xd0] sm:$0xff] %v273_v26  ;;  %525 = vst [vmem:[#allocation4 + $0xd0] sm:$0xff] %v445_v27  ;;  %v276_v34 = vadd.f32 %v660_v32, %v929_v52  ;;  %v448_v35 = vadd.f32 %v694_v33, %v934_v53  ;;  %v267_v36 = vpop.f32.mrb[27].mxu0  ;;  %v439_v37 = vpop.f32.mrb[27].mxu1 }
 0x10e   :  { %491 = vst [vmem:[#allocation2 + $0xc0] sm:$0xff] %v265_v30  ;;  %523 = vst [vmem:[#allocation4 + $0xc0] sm:$0xff] %v437_v31  ;;  %v268_v38 = vadd.f32 %v929_v52, %v267_v36  ;;  %v440_v39 = vadd.f32 %v934_v53, %v439_v37 }
 0x10f   :  { %494 = vst [vmem:[#allocation2 + $0xd8] sm:$0xff] %v276_v34  ;;  %526 = vst [vmem:[#allocation4 + $0xd8] sm:$0xff] %v448_v35 }
 0x110   :  { %492 = vst [vmem:[#allocation2 + $0xc8] sm:$0xff] %v268_v38  ;;  %524 = vst [vmem:[#allocation4 + $0xc8] sm:$0xff] %v440_v39 }
 0x112   :  { %v663_v40 = vpop.f32.mrb[28].mxu0  ;;  %v697_v41 = vpop.f32.mrb[28].mxu1 }
 0x113   :  { %v289_v42 = vadd.f32 %v663_v40, %v929_v52  ;;  %v461_v43 = vadd.f32 %v697_v41, %v934_v53  ;;  %v280_v44 = vpop.f32.mrb[29].mxu0  ;;  %v452_v45 = vpop.f32.mrb[29].mxu1 }
 0x114   :  { %v281_v46 = vadd.f32 %v929_v52, %v280_v44  ;;  %v453_v47 = vadd.f32 %v934_v53, %v452_v45  ;;  %v664_v48 = vpop.f32.mrb[30].mxu0  ;;  %v698_v49 = vpop.f32.mrb[30].mxu1 }
 0x115   :  { %497 = vst [vmem:[#allocation2 + $0xf0] sm:$0xff] %v289_v42  ;;  %529 = vst [vmem:[#allocation4 + $0xf0] sm:$0xff] %v461_v43  ;;  %v292_v50 = vadd.f32 %v664_v48, %v929_v52  ;;  %v464_v51 = vadd.f32 %v698_v49, %v934_v53  ;;  %v283_v54 = vpop.f32.mrb[31].mxu0  ;;  %v455_v55 = vpop.f32.mrb[31].mxu1 }
 0x116   :  { %495 = vst [vmem:[#allocation2 + $0xe0] sm:$0xff] %v281_v46  ;;  %527 = vst [vmem:[#allocation4 + $0xe0] sm:$0xff] %v453_v47  ;;  %v284_v56 = vadd.f32 %v929_v52, %v283_v54  ;;  %v456_v57 = vadd.f32 %v934_v53, %v455_v55 }
 0x117   :  { %498 = vst [vmem:[#allocation2 + $0xf8] sm:$0xff] %v292_v50  ;;  %530 = vst [vmem:[#allocation4 + $0xf8] sm:$0xff] %v464_v51 }
 0x118   :  { %496 = vst [vmem:[#allocation2 + $0xe8] sm:$0xff] %v284_v56  ;;  %528 = vst [vmem:[#allocation4 + $0xe8] sm:$0xff] %v456_v57 }
 0x119   :  { %716 = shalt.err (!%p713_p4)
}
 0x11a   :  { %s717_s19 = scalar_lea.hbm %s1036_s5, 4096 }
 0x11b   :  { %p718_p5 = scmp.ne.s32.totalorder %s1036_s5, %s717_s19  ;;  %p721_p6 = scmp.lt.u32.totalorder %s717_s19, %s1036_s5 }
 0x11d   :  { %p723_p7 = pnand %p721_p6, %p718_p5 }
 0x11f   :  { %726 = shalt.err (!%p723_p7)
}
 0x120   :  { %s755_s24 = smov 128   ;;  %s756_s25 = smov 8  }
 0x121   :  { %542 = dma.vmem_to_hbm [thread:$0]  %s537_s3, 4096, %s1036_s5, [#allocation3], %s755_s24, %s755_s24, %s756_s25  }
 0x122   :  { %s727_s28 = scalar_lea.vmem %s1000_s15, 4096  ;;  %p732_p9 = scmp.lt.s32.totalorder %s1000_s15, %s1000_s15 }
 0x123   :  { %p728_p8 = scmp.ne.s32.totalorder %s1000_s15, %s727_s28  ;;  %p733_p10 = scmp.lt.s32.totalorder %s727_s28, %s727_s28 }
 0x125   :  { %p734_p11 = por %p733_p10, %p732_p9 }
 0x127   :  { %p735_p12 = pnand %p734_p11, %p728_p8 }
 0x129   :  { %738 = shalt.err (!%p735_p12)
}
 0x12a   :  { %s739_s30 = scalar_lea.hbm %s1037_s6, 4096 }
 0x12b   :  { %p740_p13 = scmp.ne.s32.totalorder %s1037_s6, %s739_s30  ;;  %p743_p0 = scmp.lt.u32.totalorder %s739_s30, %s1037_s6 }
 0x12d   :  { %p745_p1 = pnand %p743_p0, %p740_p13 }
 0x12f   :  { %748 = shalt.err (!%p745_p1)
}
 0x130   :  { %554 = dma.vmem_to_hbm [thread:$0]  %s1000_s15, 4096, %s1037_s6, [#allocation5], %s755_s24, %s755_s24, %s756_s25  }
 0x131   :  { %749 = dma.done.wait [#allocation3], 4096  }
 0x132   :  { %750 = vsyncadd [#allocation3], 4294963200 }
 0x133   :  { %751 = dma.done.wait [#allocation5], 4096  }
 0x134   :  { %752 = vsyncadd [#allocation5], 4294963200 }
 0x135   :  { %561 = vsyncpa [#allocation3], 1 }
 0x136   :  { %562 = vsyncpa [#allocation5], 1 }

</bundles_post_ra>
